<compile_context>
chip_gen: v5e
topology: v5e:2x2
jax: 0.10.0
libtpu: 0.0.40
codegen_flags: <defaults>
</compile_context>

<pallas_src>
import functools

import jax
import jax.numpy as jnp
from jax.experimental import pallas as pl
from jax.experimental.pallas import tpu as pltpu


def _round_up(x, m):
    return ((x + m - 1) // m) * m


# --------------------------------------------------------------------------- #
# Kernel
# --------------------------------------------------------------------------- #
def gru_stack_kernel(x_ref, h0_ref,
                     w_i_ref, b_i_ref,          # fused input-path weights/biases (all layers)
                     w_h_ref, b_hn_ref,         # fused hidden-path weights, per-layer n-gate bias
                     w_t_ref, b_t_ref,          # linear tail
                     h_out_ref, y_out_ref,
                     *, num_layers, hp):
    f32 = jnp.float32
    mm_dtype = w_h_ref.dtype                    # f32 (default) or bf16 (v6e/v7x option)

    x = x_ref[...]                              # (TB, Sp), already in mm_dtype
    h = h0_ref[...]                             # (TB, Hp), f32 carry (gate math stays f32)

    # ONE wide MXU matmul for ALL layers' input-path gates (x is shared by every
    # layer in this module), plus a single fused bias broadcast-add:
    #   ii[:, l*3Hp + g*Hp : ...] == x @ W_i(layer l, gate g) + folded bias
    ii = jnp.dot(x, w_i_ref[...], preferred_element_type=f32) + b_i_ref[...]   # (TB, L*3Hp)

    g3 = 3 * hp
    # Static unroll: num_layers is small and known at trace time.
    # TODO(synk): for large num_layers, switch to lax.fori_loop + VMEM-scratch ii
    #             with pl.ds slicing, and stream per-layer weights (v7x 64 MiB VMEM).
    for l in range(num_layers):
        i_l = ii[:, l * g3:(l + 1) * g3]                        # lane-aligned static slice
        w_h_l = w_h_ref[:, l * g3:(l + 1) * g3]                 # (Hp, 3Hp) static slice
        hh = jnp.dot(h.astype(mm_dtype), w_h_l,
                     preferred_element_type=f32)                # (TB, 3Hp): one fused matmul
        r = jax.nn.sigmoid(i_l[:, 0 * hp:1 * hp] + hh[:, 0 * hp:1 * hp])
        z = jax.nn.sigmoid(i_l[:, 1 * hp:2 * hp] + hh[:, 1 * hp:2 * hp])
        n = jnp.tanh(i_l[:, 2 * hp:3 * hp] + r * (hh[:, 2 * hp:3 * hp] + b_hn_ref[l]))
        h = n + z * (h - n)                                     # == (1-z)*n + z*h, 1 fewer VPU op

    h_out_ref[...] = h
    # Lane-dense (Ap = multiple of 128) tail output -> unmasked stores; host slices to A.
    y_out_ref[...] = (jnp.dot(h.astype(mm_dtype), w_t_ref[...],
                              preferred_element_type=f32) + b_t_ref[...])


# --------------------------------------------------------------------------- #
# Wrapper
# --------------------------------------------------------------------------- #
def gru_recurrent_forward(x, h0, packed, *, mm_dtype=jnp.float32, batch_tile=256):
    B, S = x.shape
    H = h0.shape[1]
    L = packed["num_layers"]
    Sp, Hp, Ap = packed["sp"], packed["hp"], packed["ap"]
    A = packed["action_size"]
    G3 = 3 * Hp

    TB = min(batch_tile, _round_up(B, 8))       # batch tile (sublane-aligned)
    Bp = _round_up(B, TB)

    # Zero-pad activations to lane/sublane-aligned shapes (padding is inert).
    xp = jnp.zeros((Bp, Sp), mm_dtype).at[:B, :S].set(x.astype(mm_dtype))
    h0p = jnp.zeros((Bp, Hp), jnp.float32).at[:B, :H].set(h0.astype(jnp.float32))

    # Cast weights at the call boundary (bf16 option halves HBM->VMEM DMA bytes).
    w_i = packed["w_i"].astype(mm_dtype)        # (Sp, L*3Hp)
    w_h = packed["w_h"].astype(mm_dtype)        # (Hp, L*3Hp)
    w_t = packed["w_t"].astype(mm_dtype)        # (Hp, Ap)
    b_i = packed["b_i"]                         # (1, L*3Hp)  f32
    b_hn = packed["b_hn"]                       # (L, 1, Hp)  f32
    b_t = packed["b_t"]                         # (1, Ap)     f32

    kernel = functools.partial(gru_stack_kernel, num_layers=L, hp=Hp)

    h_out, y_out = pl.pallas_call(
        kernel,
        out_shape=(jax.ShapeDtypeStruct((Bp, Hp), jnp.float32),
                   jax.ShapeDtypeStruct((Bp, Ap), jnp.float32)),
        grid_spec=pltpu.PrefetchScalarGridSpec(
            num_scalar_prefetch=0,
            grid=(Bp // TB,),
            in_specs=[
                pl.BlockSpec((TB, Sp), lambda b: (b, 0)),        # x tile
                pl.BlockSpec((TB, Hp), lambda b: (b, 0)),        # h0 tile
                pl.BlockSpec((Sp, L * G3), lambda b: (0, 0)),    # fused input weights
                pl.BlockSpec((1, L * G3), lambda b: (0, 0)),     # fused/folded input biases
                pl.BlockSpec((Hp, L * G3), lambda b: (0, 0)),    # fused hidden weights
                pl.BlockSpec((L, 1, Hp), lambda b: (0, 0, 0)),   # n-gate hidden biases
                pl.BlockSpec((Hp, Ap), lambda b: (0, 0)),        # tail weight
                pl.BlockSpec((1, Ap), lambda b: (0, 0)),         # tail bias
            ],
            out_specs=(
                pl.BlockSpec((TB, Hp), lambda b: (b, 0)),
                pl.BlockSpec((TB, Ap), lambda b: (b, 0)),
            ),
        ),
        compiler_params=pltpu.CompilerParams(
            dimension_semantics=("parallel",)),                  # v7x: split batch across TCs
    )(xp, h0p, w_i, b_i, w_h, b_hn, w_t, b_t)

    return h_out[:B, :H], y_out[:B, :A]


# --------------------------------------------------------------------------- #
# Parameter init (PyTorch shapes) and packing (fused / padded kernel layout)
# --------------------------------------------------------------------------- #
def init_params(key, state_size, action_size, rnn_size, num_layer):
    """nn.GRUCell / nn.Linear parameter shapes, uniform(-1/sqrt(H), 1/sqrt(H))."""
    if num_layer > 1:
        # Required by the original forward (it feeds pres_state to every layer).
        assert state_size == rnn_size
    H = rnn_size
    stdv = 1.0 / float(H) ** 0.5
    keys = jax.random.split(key, 4 * num_layer + 2)
    layers = []
    for l in range(num_layer):
        in_sz = state_size if l == 0 else rnn_size
        k0, k1, k2, k3 = keys[4 * l:4 * l + 4]
        layers.append(dict(
            w_ih=jax.random.uniform(k0, (3 * H, in_sz), jnp.float32, -stdv, stdv),
            w_hh=jax.random.uniform(k1, (3 * H, H), jnp.float32, -stdv, stdv),
            b_ih=jax.random.uniform(k2, (3 * H,), jnp.float32, -stdv, stdv),
            b_hh=jax.random.uniform(k3, (3 * H,), jnp.float32, -stdv, stdv),
        ))
    w_tail = jax.random.uniform(keys[-2], (action_size, rnn_size), jnp.float32, -stdv, stdv)
    b_tail = jax.random.uniform(keys[-1], (action_size,), jnp.float32, -stdv, stdv)
    return dict(layers=layers, w_tail=w_tail, b_tail=b_tail,
                state_size=state_size, action_size=action_size,
                rnn_size=rnn_size, num_layer=num_layer)


def pack_params(params):
    """Fuse gate weights, fold r/z biases, pad everything to 128-lane boundaries."""
    S, A = params["state_size"], params["action_size"]
    H, L = params["rnn_size"], params["num_layer"]
    Sp, Hp, Ap = _round_up(S, 128), _round_up(H, 128), _round_up(A, 128)

    def pad2(w, r, c):
        return jnp.zeros((r, c), jnp.float32).at[:w.shape[0], :w.shape[1]].set(w)

    def pad1(v, n):
        return jnp.zeros((n,), jnp.float32).at[:v.shape[0]].set(v)

    w_i_cols, b_i_cols, w_h_cols, b_hn_layers = [], [], [], []
    for lyr in params["layers"]:
        w_ih, w_hh, b_ih, b_hh = lyr["w_ih"], lyr["w_hh"], lyr["b_ih"], lyr["b_hh"]
        # PyTorch GRUCell gate order: r, z, n.  Transpose to (in, out), pad, fuse along lanes.
        gates_i = [pad2(w_ih[g * H:(g + 1) * H].T, Sp, Hp) for g in range(3)]
        gates_h = [pad2(w_hh[g * H:(g + 1) * H].T, Hp, Hp) for g in range(3)]
        w_i_cols.append(jnp.concatenate(gates_i, axis=1))                  # (Sp, 3Hp)
        w_h_cols.append(jnp.concatenate(gates_h, axis=1))                  # (Hp, 3Hp)
        # Fold b_ih + b_hh for r,z; keep n's hidden bias separate (inside r*(.)).
        b_r = b_ih[0:H] + b_hh[0:H]
        b_z = b_ih[H:2 * H] + b_hh[H:2 * H]
        b_in = b_ih[2 * H:3 * H]
        b_i_cols.append(jnp.concatenate([pad1(b_r, Hp), pad1(b_z, Hp), pad1(b_in, Hp)]))
        b_hn_layers.append(pad1(b_hh[2 * H:3 * H], Hp)[None, :])           # (1, Hp)

    return dict(
        w_i=jnp.concatenate(w_i_cols, axis=1),     # (Sp, L*3Hp)
        b_i=jnp.concatenate(b_i_cols)[None, :],    # (1, L*3Hp)
        w_h=jnp.concatenate(w_h_cols, axis=1),     # (Hp, L*3Hp)  2-D lane-major slab
        b_hn=jnp.stack(b_hn_layers, axis=0),       # (L, 1, Hp)
        w_t=pad2(params["w_tail"].T, Hp, Ap),      # (Hp, Ap)
        b_t=jnp.zeros((1, Ap), jnp.float32).at[0, :A].set(params["b_tail"]),
        num_layers=L, sp=Sp, hp=Hp, ap=Ap, action_size=A,
    )


# --------------------------------------------------------------------------- #
# Pure-JAX reference of the exact PyTorch forward semantics (unfused, unpadded)
# --------------------------------------------------------------------------- #
def reference_forward(x, h0, params):
    H = params["rnn_size"]
    h = h0
    for lyr in params["layers"]:
        gi = x @ lyr["w_ih"].T + lyr["b_ih"]
        gh = h @ lyr["w_hh"].T + lyr["b_hh"]
        i_r, i_z, i_n = gi[:, :H], gi[:, H:2 * H], gi[:, 2 * H:]
        h_r, h_z, h_n = gh[:, :H], gh[:, H:2 * H], gh[:, 2 * H:]
        r = jax.nn.sigmoid(i_r + h_r)
        z = jax.nn.sigmoid(i_z + h_z)
        n = jnp.tanh(i_n + r * h_n)
        h = (1.0 - z) * n + z * h
    y = h @ params["w_tail"].T + params["b_tail"]
    return h, y


if __name__ == "__main__":
    # Small, module-consistent shapes (state_size == rnn_size so the original
    # forward's "feed pres_state to every layer" is well-defined).
    batch_size = 4
    state_size = 32
    rnn_size = 32
    action_size = 8
    num_layer = 2

    key = jax.random.PRNGKey(0)
    k_params, k_x, k_h = jax.random.split(key, 3)

    params = init_params(k_params, state_size, action_size, rnn_size, num_layer)
    packed = pack_params(params)

    pres_state = jax.random.normal(k_x, (batch_size, state_size), jnp.float32)
    prev_hidden_state = jax.random.normal(k_h, (batch_size, rnn_size), jnp.float32)

    h_out, y_out = gru_recurrent_forward(pres_state, prev_hidden_state, packed)
    jax.block_until_ready((h_out, y_out))

    h_ref, y_ref = reference_forward(pres_state, prev_hidden_state, params)
    assert h_out.shape == (batch_size, rnn_size)
    assert y_out.shape == (batch_size, action_size)
    assert jnp.allclose(h_out, h_ref, atol=1e-5, rtol=1e-5)
    assert jnp.allclose(y_out, y_ref, atol=1e-5, rtol=1e-5)

    print("KERNEL_OK")
</pallas_src>

<mosaic_0001>
module attributes {stable_mosaic.version = 11 : i64} {
  func.func @gru_stack_kernel(%arg0: i32, %arg1: memref<8x128xf32, #tpu.memory_space<vmem>>, %arg2: memref<8x128xf32, #tpu.memory_space<vmem>>, %arg3: memref<128x768xf32, #tpu.memory_space<vmem>>, %arg4: memref<1x768xf32, #tpu.memory_space<vmem>>, %arg5: memref<128x768xf32, #tpu.memory_space<vmem>>, %arg6: memref<2x1x128xf32, #tpu.memory_space<vmem>>, %arg7: memref<128x128xf32, #tpu.memory_space<vmem>>, %arg8: memref<1x128xf32, #tpu.memory_space<vmem>>, %arg9: memref<8x128xf32, #tpu.memory_space<vmem>>, %arg10: memref<8x128xf32, #tpu.memory_space<vmem>>) attributes {dimension_semantics = [#tpu.dimension_semantics<parallel>], iteration_bounds = array<i64: 1>, scalar_prefetch = 0 : i64, scratch_operands = 0 : i64, tpu.core_type = #tpu.core_type<tc>, window_params = [{transform_indices = @transform_0, window_bounds = array<i64: 8, 128>}, {transform_indices = @transform_1, window_bounds = array<i64: 8, 128>}, {pipeline_mode = #tpu.pipeline_mode<synchronous>, transform_indices = @transform_2, window_bounds = array<i64: 128, 768>}, {pipeline_mode = #tpu.pipeline_mode<synchronous>, transform_indices = @transform_3, window_bounds = array<i64: 1, 768>}, {pipeline_mode = #tpu.pipeline_mode<synchronous>, transform_indices = @transform_4, window_bounds = array<i64: 128, 768>}, {pipeline_mode = #tpu.pipeline_mode<synchronous>, transform_indices = @transform_5, window_bounds = array<i64: 2, 1, 128>}, {pipeline_mode = #tpu.pipeline_mode<synchronous>, transform_indices = @transform_6, window_bounds = array<i64: 128, 128>}, {pipeline_mode = #tpu.pipeline_mode<synchronous>, transform_indices = @transform_7, window_bounds = array<i64: 1, 128>}, {transform_indices = @transform_8, window_bounds = array<i64: 8, 128>}, {transform_indices = @transform_9, window_bounds = array<i64: 8, 128>}]} {
    %c0 = arith.constant 0 : index
    %c0_0 = arith.constant 0 : index
    %0 = vector.load %arg1[%c0, %c0_0] : memref<8x128xf32, #tpu.memory_space<vmem>>, vector<8x128xf32>
    %c0_1 = arith.constant 0 : index
    %c0_2 = arith.constant 0 : index
    %1 = vector.load %arg2[%c0_1, %c0_2] : memref<8x128xf32, #tpu.memory_space<vmem>>, vector<8x128xf32>
    %c0_3 = arith.constant 0 : index
    %c0_4 = arith.constant 0 : index
    %2 = vector.load %arg3[%c0_3, %c0_4] : memref<128x768xf32, #tpu.memory_space<vmem>>, vector<128x768xf32>
    %cst = arith.constant dense<0.000000e+00> : vector<8x768xf32>
    %3 = tpu.matmul %0, %2, %cst {dimension_numbers = #tpu.dot_dimension_numbers<[1], [0], [0], [1], [0, 0, 1, 1], [], []>} : vector<8x128xf32>, vector<128x768xf32>, vector<8x768xf32> -> vector<8x768xf32>
    %c0_5 = arith.constant 0 : index
    %c0_6 = arith.constant 0 : index
    %4 = vector.load %arg4[%c0_5, %c0_6] : memref<1x768xf32, #tpu.memory_space<vmem>>, vector<1x768xf32>
    %5 = vector.broadcast %4 : vector<1x768xf32> to vector<8x768xf32>
    %6 = arith.addf %3, %5 : vector<8x768xf32>
    %7 = vector.extract_strided_slice %6 {offsets = [0, 0], sizes = [8, 384], strides = [1, 1]} : vector<8x768xf32> to vector<8x384xf32>
    %c0_7 = arith.constant 0 : index
    %c0_8 = arith.constant 0 : index
    %8 = vector.load %arg5[%c0_7, %c0_8] : memref<128x768xf32, #tpu.memory_space<vmem>>, vector<128x384xf32>
    %cst_9 = arith.constant dense<0.000000e+00> : vector<8x384xf32>
    %9 = tpu.matmul %1, %8, %cst_9 {dimension_numbers = #tpu.dot_dimension_numbers<[1], [0], [0], [1], [0, 0, 1, 1], [], []>} : vector<8x128xf32>, vector<128x384xf32>, vector<8x384xf32> -> vector<8x384xf32>
    %10 = vector.extract_strided_slice %7 {offsets = [0, 0], sizes = [8, 128], strides = [1, 1]} : vector<8x384xf32> to vector<8x128xf32>
    %11 = vector.extract_strided_slice %9 {offsets = [0, 0], sizes = [8, 128], strides = [1, 1]} : vector<8x384xf32> to vector<8x128xf32>
    %12 = arith.addf %10, %11 : vector<8x128xf32>
    %13 = arith.negf %12 : vector<8x128xf32>
    %14 = math.exp %13 : vector<8x128xf32>
    %cst_10 = arith.constant 1.000000e+00 : f32
    %15 = vector.broadcast %cst_10 : f32 to vector<8x128xf32>
    %16 = arith.addf %15, %14 : vector<8x128xf32>
    %17 = arith.divf %15, %16 : vector<8x128xf32>
    %18 = vector.extract_strided_slice %7 {offsets = [0, 128], sizes = [8, 128], strides = [1, 1]} : vector<8x384xf32> to vector<8x128xf32>
    %19 = vector.extract_strided_slice %9 {offsets = [0, 128], sizes = [8, 128], strides = [1, 1]} : vector<8x384xf32> to vector<8x128xf32>
    %20 = arith.addf %18, %19 : vector<8x128xf32>
    %21 = arith.negf %20 : vector<8x128xf32>
    %22 = math.exp %21 : vector<8x128xf32>
    %cst_11 = arith.constant 1.000000e+00 : f32
    %23 = vector.broadcast %cst_11 : f32 to vector<8x128xf32>
    %24 = arith.addf %23, %22 : vector<8x128xf32>
    %25 = arith.divf %23, %24 : vector<8x128xf32>
    %26 = vector.extract_strided_slice %7 {offsets = [0, 256], sizes = [8, 128], strides = [1, 1]} : vector<8x384xf32> to vector<8x128xf32>
    %27 = vector.extract_strided_slice %9 {offsets = [0, 256], sizes = [8, 128], strides = [1, 1]} : vector<8x384xf32> to vector<8x128xf32>
    %c0_12 = arith.constant 0 : index
    %c0_13 = arith.constant 0 : index
    %c0_14 = arith.constant 0 : index
    %28 = vector.load %arg6[%c0_12, %c0_13, %c0_14] : memref<2x1x128xf32, #tpu.memory_space<vmem>>, vector<1x1x128xf32>
    %29 = vector.shape_cast %28 : vector<1x1x128xf32> to vector<1x128xf32>
    %30 = vector.broadcast %29 : vector<1x128xf32> to vector<8x128xf32>
    %31 = arith.addf %27, %30 : vector<8x128xf32>
    %32 = arith.mulf %17, %31 : vector<8x128xf32>
    %33 = arith.addf %26, %32 : vector<8x128xf32>
    %34 = math.tanh %33 : vector<8x128xf32>
    %35 = arith.subf %1, %34 : vector<8x128xf32>
    %36 = arith.mulf %25, %35 : vector<8x128xf32>
    %37 = arith.addf %34, %36 : vector<8x128xf32>
    %38 = vector.extract_strided_slice %6 {offsets = [0, 384], sizes = [8, 384], strides = [1, 1]} : vector<8x768xf32> to vector<8x384xf32>
    %c0_15 = arith.constant 0 : index
    %c384 = arith.constant 384 : index
    %39 = vector.load %arg5[%c0_15, %c384] : memref<128x768xf32, #tpu.memory_space<vmem>>, vector<128x384xf32>
    %cst_16 = arith.constant dense<0.000000e+00> : vector<8x384xf32>
    %40 = tpu.matmul %37, %39, %cst_16 {dimension_numbers = #tpu.dot_dimension_numbers<[1], [0], [0], [1], [0, 0, 1, 1], [], []>} : vector<8x128xf32>, vector<128x384xf32>, vector<8x384xf32> -> vector<8x384xf32>
    %41 = vector.extract_strided_slice %38 {offsets = [0, 0], sizes = [8, 128], strides = [1, 1]} : vector<8x384xf32> to vector<8x128xf32>
    %42 = vector.extract_strided_slice %40 {offsets = [0, 0], sizes = [8, 128], strides = [1, 1]} : vector<8x384xf32> to vector<8x128xf32>
    %43 = arith.addf %41, %42 : vector<8x128xf32>
    %44 = arith.negf %43 : vector<8x128xf32>
    %45 = math.exp %44 : vector<8x128xf32>
    %cst_17 = arith.constant 1.000000e+00 : f32
    %46 = vector.broadcast %cst_17 : f32 to vector<8x128xf32>
    %47 = arith.addf %46, %45 : vector<8x128xf32>
    %48 = arith.divf %46, %47 : vector<8x128xf32>
    %49 = vector.extract_strided_slice %38 {offsets = [0, 128], sizes = [8, 128], strides = [1, 1]} : vector<8x384xf32> to vector<8x128xf32>
    %50 = vector.extract_strided_slice %40 {offsets = [0, 128], sizes = [8, 128], strides = [1, 1]} : vector<8x384xf32> to vector<8x128xf32>
    %51 = arith.addf %49, %50 : vector<8x128xf32>
    %52 = arith.negf %51 : vector<8x128xf32>
    %53 = math.exp %52 : vector<8x128xf32>
    %cst_18 = arith.constant 1.000000e+00 : f32
    %54 = vector.broadcast %cst_18 : f32 to vector<8x128xf32>
    %55 = arith.addf %54, %53 : vector<8x128xf32>
    %56 = arith.divf %54, %55 : vector<8x128xf32>
    %57 = vector.extract_strided_slice %38 {offsets = [0, 256], sizes = [8, 128], strides = [1, 1]} : vector<8x384xf32> to vector<8x128xf32>
    %58 = vector.extract_strided_slice %40 {offsets = [0, 256], sizes = [8, 128], strides = [1, 1]} : vector<8x384xf32> to vector<8x128xf32>
    %c1 = arith.constant 1 : index
    %c0_19 = arith.constant 0 : index
    %c0_20 = arith.constant 0 : index
    %59 = vector.load %arg6[%c1, %c0_19, %c0_20] : memref<2x1x128xf32, #tpu.memory_space<vmem>>, vector<1x1x128xf32>
    %60 = vector.shape_cast %59 : vector<1x1x128xf32> to vector<1x128xf32>
    %61 = vector.broadcast %60 : vector<1x128xf32> to vector<8x128xf32>
    %62 = arith.addf %58, %61 : vector<8x128xf32>
    %63 = arith.mulf %48, %62 : vector<8x128xf32>
    %64 = arith.addf %57, %63 : vector<8x128xf32>
    %65 = math.tanh %64 : vector<8x128xf32>
    %66 = arith.subf %37, %65 : vector<8x128xf32>
    %67 = arith.mulf %56, %66 : vector<8x128xf32>
    %68 = arith.addf %65, %67 : vector<8x128xf32>
    %c0_21 = arith.constant 0 : index
    %c0_22 = arith.constant 0 : index
    %69 = vector.load %arg9[%c0_21, %c0_22] : memref<8x128xf32, #tpu.memory_space<vmem>>, vector<8x128xf32>
    tpu.vector_store %arg9[%c0_21, %c0_22], %68 {strides = array<i32>} : memref<8x128xf32, #tpu.memory_space<vmem>>, vector<8x128xf32>,
    %c0_23 = arith.constant 0 : index
    %c0_24 = arith.constant 0 : index
    %70 = vector.load %arg7[%c0_23, %c0_24] : memref<128x128xf32, #tpu.memory_space<vmem>>, vector<128x128xf32>
    %cst_25 = arith.constant dense<0.000000e+00> : vector<8x128xf32>
    %71 = tpu.matmul %68, %70, %cst_25 {dimension_numbers = #tpu.dot_dimension_numbers<[1], [0], [0], [1], [0, 0, 1, 1], [], []>} : vector<8x128xf32>, vector<128x128xf32>, vector<8x128xf32> -> vector<8x128xf32>
    %c0_26 = arith.constant 0 : index
    %c0_27 = arith.constant 0 : index
    %72 = vector.load %arg8[%c0_26, %c0_27] : memref<1x128xf32, #tpu.memory_space<vmem>>, vector<1x128xf32>
    %73 = vector.broadcast %72 : vector<1x128xf32> to vector<8x128xf32>
    %74 = arith.addf %71, %73 : vector<8x128xf32>
    %c0_28 = arith.constant 0 : index
    %c0_29 = arith.constant 0 : index
    %75 = vector.load %arg10[%c0_28, %c0_29] : memref<8x128xf32, #tpu.memory_space<vmem>>, vector<8x128xf32>
    tpu.vector_store %arg10[%c0_28, %c0_29], %74 {strides = array<i32>} : memref<8x128xf32, #tpu.memory_space<vmem>>, vector<8x128xf32>,
    return
  }
  func.func @transform_0(%arg0: i32) -> (i32, i32) {
    %c0_i32 = arith.constant 0 : i32
    %c0_i32_0 = arith.constant 0 : i32
    return %arg0, %c0_i32 : i32, i32
  }
  func.func @transform_1(%arg0: i32) -> (i32, i32) {
    %c0_i32 = arith.constant 0 : i32
    %c0_i32_0 = arith.constant 0 : i32
    return %arg0, %c0_i32 : i32, i32
  }
  func.func @transform_2(%arg0: i32) -> (i32, i32) {
    %c0_i32 = arith.constant 0 : i32
    %c0_i32_0 = arith.constant 0 : i32
    %c0_i32_1 = arith.constant 0 : i32
    return %c0_i32, %c0_i32_0 : i32, i32
  }
  func.func @transform_3(%arg0: i32) -> (i32, i32) {
    %c0_i32 = arith.constant 0 : i32
    %c0_i32_0 = arith.constant 0 : i32
    %c0_i32_1 = arith.constant 0 : i32
    return %c0_i32, %c0_i32_0 : i32, i32
  }
  func.func @transform_4(%arg0: i32) -> (i32, i32) {
    %c0_i32 = arith.constant 0 : i32
    %c0_i32_0 = arith.constant 0 : i32
    %c0_i32_1 = arith.constant 0 : i32
    return %c0_i32, %c0_i32_0 : i32, i32
  }
  func.func @transform_5(%arg0: i32) -> (i32, i32, i32) {
    %c0_i32 = arith.constant 0 : i32
    %c0_i32_0 = arith.constant 0 : i32
    %c0_i32_1 = arith.constant 0 : i32
    %c0_i32_2 = arith.constant 0 : i32
    return %c0_i32, %c0_i32_0, %c0_i32_1 : i32, i32, i32
  }
  func.func @transform_6(%arg0: i32) -> (i32, i32) {
    %c0_i32 = arith.constant 0 : i32
    %c0_i32_0 = arith.constant 0 : i32
    %c0_i32_1 = arith.constant 0 : i32
    return %c0_i32, %c0_i32_0 : i32, i32
  }
  func.func @transform_7(%arg0: i32) -> (i32, i32) {
    %c0_i32 = arith.constant 0 : i32
    %c0_i32_0 = arith.constant 0 : i32
    %c0_i32_1 = arith.constant 0 : i32
    return %c0_i32, %c0_i32_0 : i32, i32
  }
  func.func @transform_8(%arg0: i32) -> (i32, i32) {
    %c0_i32 = arith.constant 0 : i32
    %c0_i32_0 = arith.constant 0 : i32
    return %arg0, %c0_i32 : i32, i32
  }
  func.func @transform_9(%arg0: i32) -> (i32, i32) {
    %c0_i32 = arith.constant 0 : i32
    %c0_i32_0 = arith.constant 0 : i32
    return %arg0, %c0_i32 : i32, i32
  }
}

</mosaic_0001>

<bundles_post_ra>
// kernel: tpu_custom_call.1
= control target key start
LH: loop header
LB: loop body
LE: loop exit
PB: predicated region body
PF: predicated region fallthrough
CT: control target
= control target key end

     0   :  { %15 = vsyncpa [#allocation3], 0  ;;  %s1129_s0 = inlined_call_operand.hbm [shape: f32[8,128], index: 0, kind: input, shape index: {}]   ;;  %s1130_s1 = inlined_call_operand.hbm [shape: f32[8,128], index: 1, kind: input, shape index: {}]   ;;  %s1131_s2 = inlined_call_operand.hbm [shape: f32[128,768], index: 2, kind: input, shape index: {}]   ;;  %s1132_s3 = inlined_call_operand.hbm [shape: f32[1,768], index: 3, kind: input, shape index: {}]   ;;  %s1133_s4 = inlined_call_operand.hbm [shape: f32[128,768], index: 4, kind: input, shape index: {}]   ;;  %s1134_s5 = inlined_call_operand.vmem [shape: f32[2,1,128], index: 5, kind: input, shape index: {}]   ;;  %s1135_s6 = inlined_call_operand.hbm [shape: f32[128,128], index: 6, kind: input, shape index: {}]   ;;  %s1136_s7 = inlined_call_operand.vmem [shape: f32[1,128], index: 7, kind: input, shape index: {}]   ;;  %s1137_s8 = inlined_call_operand.hbm [shape: f32[8,128], index: 8, kind: output, shape index: {0}]   ;;  %s1138_s9 = inlined_call_operand.hbm [shape: f32[8,128], index: 9, kind: output, shape index: {1}]  }
   0x1   :  { %16 = vsyncpa [#allocation6], 0 }
   0x2   :  { %17 = vsyncpa [#allocation9], 0 }
   0x3   :  { %18 = vsyncpa [#allocation12], 0 }
   0x4   :  { %19 = vsyncpa [#allocation4], 0  ;;  %s37_s11 = sshll.u32 %s1130_s1, 4  ;;  %s38_s11 = int_to_ptr.hbm [resolvable:$true] %s37_s11 }
   0x5   :  { %20 = vsyncpa [#allocation15], 0  ;;  %s994_s12 = smov [#allocation5]   ;;  %s61_s16 = sshll.u32 %s1132_s3, 4  ;;  %s62_s16 = int_to_ptr.hbm [resolvable:$true] %s61_s16 }
   0x6   :  { %s39_s13 = sshll.u32 %s994_s12, 4  ;;  %s995_s17 = smov [#allocation8]   ;;  %s40_s13 = int_to_ptr.vmem [resolvable:$true] %s39_s13 }
   0x7   :  { %42 = dma.hbm_to_vmem [thread:$0]  %s38_s11, 128, %s40_s13, [#allocation6]  }
   0x8   :  { %s63_s18 = sshll.u32 %s995_s17, 4  ;;  %s26_s21 = sshll.u32 %s1129_s0, 4  ;;  %s64_s18 = int_to_ptr.vmem [resolvable:$true] %s63_s18  ;;  %s27_s21 = int_to_ptr.hbm [resolvable:$true] %s26_s21 }
   0x9   :  { %66 = dma.hbm_to_vmem [thread:$0]  %s62_s16, 96, %s64_s18, [#allocation9]  }
   0xa   :  { %s47_s23 = sshll.u32 %s1131_s2, 4  ;;  %s996_s24 = smov [#allocation2]   ;;  %s48_s23 = int_to_ptr.hbm [resolvable:$true] %s47_s23 }
   0xb   :  { %s28_s25 = sshll.u32 %s996_s24, 4  ;;  %s997_s3 = smov [#allocation7]   ;;  %s29_s25 = int_to_ptr.vmem [resolvable:$true] %s28_s25 }
   0xc   :  { %31 = dma.hbm_to_vmem [thread:$0]  %s27_s21, 128, %s29_s25, [#allocation3]  }
   0xd   :  { %s49_s26 = sshll.u32 %s997_s3, 4  ;;  %s998_s27 = smov 768   ;;  %s50_s26 = int_to_ptr.vmem [resolvable:$true] %s49_s26 }
   0xe   :  { %s999_s28 = smov 48   ;;  %s71_s30 = sshll.u32 %s1133_s4, 4  ;;  %s72_s30 = int_to_ptr.hbm [resolvable:$true] %s71_s30 }
   0xf   :  { %55 = dma.hbm_to_vmem [thread:$0]  %s48_s23, 12288, %s50_s26, [#allocation6], %s998_s27, %s998_s27, %s999_s28  }
  0x10   :  { %s1000_s10 = smov [#allocation10]   ;;  %s86_s13 = sshll.u32 %s1135_s6, 4  ;;  %s87_s13 = int_to_ptr.hbm [resolvable:$true] %s86_s13 }
  0x11   :  { %s73_s11 = sshll.u32 %s1000_s10, 4  ;;  %s1001_s14 = smov [#allocation11]   ;;  %s74_s11 = int_to_ptr.vmem [resolvable:$true] %s73_s11 }
  0x12   :  { %79 = dma.hbm_to_vmem [thread:$0]  %s72_s30, 12288, %s74_s11, [#allocation9], %s998_s27, %s998_s27, %s999_s28  }
  0x13   :  { %s88_s15 = sshll.u32 %s1001_s14, 4  ;;  %s1002_s16 = smov 128   ;;  %s89_s15 = int_to_ptr.vmem [resolvable:$true] %s88_s15 }
  0x14   :  { %s1003_s17 = smov 8  }
  0x15   :  { %94 = dma.hbm_to_vmem [thread:$0]  %s87_s13, 2048, %s89_s15, [#allocation12], %s1002_s16, %s1002_s16, %s1003_s17  }
  0x16   :  { %982 = dma.done.wait [#allocation3], 128  }
  0x17   :  { %983 = vsyncadd [#allocation3], 4294967168 }
  0x18   :  { %984 = dma.done.wait [#allocation6], 12416  }
  0x19   :  { %985 = vsyncadd [#allocation6], 4294954880 }
  0x1a   :  { %986 = dma.done.wait [#allocation9], 12384  }
  0x1b   :  { %987 = vsyncadd [#allocation9], 4294954912 }
  0x1c   :  { %988 = dma.done.wait [#allocation12], 2048  }
  0x1d   :  { %989 = vsyncadd [#allocation12], 4294965248  ;;  %v215_v0 = vld [vmem:[#allocation7 + $0x2e0] sm:$0xff]  ;;  %v216_v1 = vld [vmem:[#allocation7 + $0x2e8] sm:$0xff]  ;;  %s721_s22 = sshll.u32 %s1137_s8, 4  ;;  %s1005_s25 = smov [#allocation14]   ;;  %s722_s22 = int_to_ptr.hbm [resolvable:$true] %s721_s22 }
  0x1e   :  { %v209_v2 = vld [vmem:[#allocation7 + $0x2b0] sm:$0xff]  ;;  %273 = vmatpush.msra.mxu2 %v215_v0  ;;  %293 = vmatpush.msra.mxu3 %v216_v1  ;;  %v210_v3 = vld [vmem:[#allocation7 + $0x2b8] sm:$0xff]  ;;  %v203_v5 = vld [vmem:[#allocation7 + $0x280] sm:$0xff]  ;;  %s730_s3 = sshll.u32 %s1005_s25, 4  ;;  %s732_s28 = sshll.u32 %s1138_s9, 4  ;;  %s731_s3 = int_to_ptr.vmem [resolvable:$true] %s730_s3  ;;  %s733_s28 = int_to_ptr.hbm [resolvable:$true] %s732_s28 }
  0x1f   :  { %v213_v4 = vld [vmem:[#allocation7 + $0x2d0] sm:$0xff]  ;;  %v204_v6 = vld [vmem:[#allocation7 + $0x288] sm:$0xff]  ;;  %v207_v7 = vld [vmem:[#allocation7 + $0x2a0] sm:$0xff] }
  0x20   :  { %233 = vmatpush.msra.mxu0 %v213_v4  ;;  %274 = vmatpush.msra.mxu2 %v209_v2  ;;  %v201_v8 = vld [vmem:[#allocation7 + $0x270] sm:$0xff]  ;;  %v198_v10 = vld [vmem:[#allocation7 + $0x258] sm:$0xff]  ;;  %v195_v11 = vld [vmem:[#allocation7 + $0x240] sm:$0xff] }
  0x21   :  { %294 = vmatpush.msra.mxu3 %v210_v3  ;;  %v197_v9 = vld [vmem:[#allocation7 + $0x250] sm:$0xff]  ;;  %v191_v12 = vld [vmem:[#allocation7 + $0x220] sm:$0xff]  ;;  %v192_v13 = vld [vmem:[#allocation7 + $0x228] sm:$0xff] }
  0x22   :  { %234 = vmatpush.msra.mxu0 %v207_v7  ;;  %275 = vmatpush.msra.mxu2 %v203_v5  ;;  %v189_v14 = vld [vmem:[#allocation7 + $0x210] sm:$0xff]  ;;  %v186_v16 = vld [vmem:[#allocation7 + $0x1f8] sm:$0xff]  ;;  %v183_v17 = vld [vmem:[#allocation7 + $0x1e0] sm:$0xff] }
  0x23   :  { %295 = vmatpush.msra.mxu3 %v204_v6  ;;  %v185_v15 = vld [vmem:[#allocation7 + $0x1f0] sm:$0xff]  ;;  %v179_v18 = vld [vmem:[#allocation7 + $0x1c0] sm:$0xff]  ;;  %v180_v19 = vld [vmem:[#allocation7 + $0x1c8] sm:$0xff] }
  0x24   :  { %235 = vmatpush.msra.mxu0 %v201_v8  ;;  %276 = vmatpush.msra.mxu2 %v197_v9  ;;  %v177_v20 = vld [vmem:[#allocation7 + $0x1b0] sm:$0xff]  ;;  %v174_v22 = vld [vmem:[#allocation7 + $0x198] sm:$0xff]  ;;  %v171_v23 = vld [vmem:[#allocation7 + $0x180] sm:$0xff] }
  0x25   :  { %296 = vmatpush.msra.mxu3 %v198_v10  ;;  %v173_v21 = vld [vmem:[#allocation7 + $0x190] sm:$0xff]  ;;  %v167_v24 = vld [vmem:[#allocation7 + $0x160] sm:$0xff]  ;;  %v168_v25 = vld [vmem:[#allocation7 + $0x168] sm:$0xff] }
  0x26   :  { %236 = vmatpush.msra.mxu0 %v195_v11  ;;  %277 = vmatpush.msra.mxu2 %v191_v12  ;;  %v165_v26 = vld [vmem:[#allocation7 + $0x150] sm:$0xff]  ;;  %v162_v28 = vld [vmem:[#allocation7 + $0x138] sm:$0xff]  ;;  %v159_v29 = vld [vmem:[#allocation7 + $0x120] sm:$0xff] }
  0x27   :  { %297 = vmatpush.msra.mxu3 %v192_v13  ;;  %v161_v27 = vld [vmem:[#allocation7 + $0x130] sm:$0xff]  ;;  %v214_v30 = vld [vmem:[#allocation7 + $0x2d8] sm:$0xff]  ;;  %v155_v31 = vld [vmem:[#allocation7 + $0x100] sm:$0xff] }
  0x28   :  { %237 = vmatpush.msra.mxu0 %v189_v14  ;;  %278 = vmatpush.msra.mxu2 %v185_v15  ;;  %v156_v32 = vld [vmem:[#allocation7 + $0x108] sm:$0xff]  ;;  %v153_v33 = vld [vmem:[#allocation7 + $0xf0] sm:$0xff]  ;;  %v150_v36 = vld [vmem:[#allocation7 + $0xd8] sm:$0xff] }
  0x29   :  { %298 = vmatpush.msra.mxu3 %v186_v16  ;;  %253 = vmatpush.msra.mxu1 %v214_v30  ;;  %v208_v34 = vld [vmem:[#allocation7 + $0x2a8] sm:$0xff]  ;;  %v149_v35 = vld [vmem:[#allocation7 + $0xd0] sm:$0xff]  ;;  %v202_v37 = vld [vmem:[#allocation7 + $0x278] sm:$0xff] }
  0x2a   :  { %238 = vmatpush.msra.mxu0 %v183_v17  ;;  %279 = vmatpush.msra.mxu2 %v179_v18  ;;  %v147_v38 = vld [vmem:[#allocation7 + $0xc0] sm:$0xff]  ;;  %v196_v39 = vld [vmem:[#allocation7 + $0x248] sm:$0xff]  ;;  %v141_v42 = vld [vmem:[#allocation7 + $0x90] sm:$0xff] }
  0x2b   :  { %299 = vmatpush.msra.mxu3 %v180_v19  ;;  %254 = vmatpush.msra.mxu1 %v208_v34  ;;  %v143_v40 = vld [vmem:[#allocation7 + $0xa0] sm:$0xff]  ;;  %v144_v41 = vld [vmem:[#allocation7 + $0xa8] sm:$0xff]  ;;  %v190_v43 = vld [vmem:[#allocation7 + $0x218] sm:$0xff] }
  0x2c   :  { %239 = vmatpush.msra.mxu0 %v177_v20  ;;  %280 = vmatpush.msra.mxu2 %v173_v21  ;;  %v137_v44 = vld [vmem:[#allocation7 + $0x70] sm:$0xff]  ;;  %v138_v45 = vld [vmem:[#allocation7 + $0x78] sm:$0xff]  ;;  %v135_v46 = vld [vmem:[#allocation7 + $0x60] sm:$0xff] }
  0x2d   :  { %300 = vmatpush.msra.mxu3 %v174_v22  ;;  %255 = vmatpush.msra.mxu1 %v202_v37  ;;  %v184_v47 = vld [vmem:[#allocation7 + $0x1e8] sm:$0xff]  ;;  %v131_v48 = vld [vmem:[#allocation7 + $0x40] sm:$0xff]  ;;  %v129_v50 = vld [vmem:[#allocation7 + $0x30] sm:$0xff] }
  0x2e   :  { %240 = vmatpush.msra.mxu0 %v171_v23  ;;  %281 = vmatpush.msra.mxu2 %v167_v24  ;;  %v132_v49 = vld [vmem:[#allocation7 + $0x48] sm:$0xff]  ;;  %v178_v51 = vld [vmem:[#allocation7 + $0x1b8] sm:$0xff]  ;;  %v125_v52 = vld [vmem:[#allocation7 + $0x10] sm:$0xff] }
  0x2f   :  { %301 = vmatpush.msra.mxu3 %v168_v25  ;;  %256 = vmatpush.msra.mxu1 %v196_v39  ;;  %v126_v53 = vld [vmem:[#allocation7 + $0x18] sm:$0xff]  ;;  %v123_v56 = vld [vmem:[#allocation7] sm:$0xff]  ;;  %v172_v57 = vld [vmem:[#allocation7 + $0x188] sm:$0xff] }
  0x30   :  { %241 = vmatpush.msra.mxu0 %v165_v26  ;;  %282 = vmatpush.msra.mxu2 %v161_v27  ;;  %v398_v54 = vld [vmem:[#allocation10 + $0x2d0] sm:$0xff]  ;;  %v399_v55 = vld [vmem:[#allocation10 + $0x2d8] sm:$0xff]  ;;  %v395_v58 = vld [vmem:[#allocation10 + $0x2a0] sm:$0xff] }
  0x31   :  { %302 = vmatpush.msra.mxu3 %v162_v28  ;;  %257 = vmatpush.msra.mxu1 %v190_v43  ;;  %v396_v59 = vld [vmem:[#allocation10 + $0x2a8] sm:$0xff]  ;;  %v166_v61 = vld [vmem:[#allocation7 + $0x158] sm:$0xff]  ;;  %v211_v0 = vld [vmem:[#allocation7 + $0x2c0] sm:$0xff] }
  0x32   :  { %242 = vmatpush.msra.mxu0 %v159_v29  ;;  %283 = vmatpush.msra.mxu2 %v155_v31  ;;  %v217_v60 = vld [vmem:[#allocation7 + $0x2f0] sm:$0xff]  ;;  %v393_v63 = vld [vmem:[#allocation10 + $0x278] sm:$0xff]  ;;  %v160_v1 = vld [vmem:[#allocation7 + $0x128] sm:$0xff] }
  0x33   :  { %303 = vmatpush.msra.mxu3 %v156_v32  ;;  %258 = vmatpush.msra.mxu1 %v184_v47  ;;  %v392_v62 = vld [vmem:[#allocation10 + $0x270] sm:$0xff]  ;;  %v389_v2 = vld [vmem:[#allocation10 + $0x240] sm:$0xff]  ;;  %v390_v3 = vld [vmem:[#allocation10 + $0x248] sm:$0xff] }
  0x34   :  { %243 = vmatpush.msra.mxu0 %v153_v33  ;;  %284 = vmatpush.msra.mxu2 %v149_v35  ;;  %v205_v4 = vld [vmem:[#allocation7 + $0x290] sm:$0xff]  ;;  %v387_v7 = vld [vmem:[#allocation10 + $0x218] sm:$0xff]  ;;  %v383_v9 = vld [vmem:[#allocation10 + $0x1e0] sm:$0xff] }
  0x35   :  { %304 = vmatpush.msra.mxu3 %v150_v36  ;;  %259 = vmatpush.msra.mxu1 %v178_v51  ;;  %v1074_v5 = vld [vmem:[#allocation2] sm:$0xff]  ;;  %v199_v8 = vld [vmem:[#allocation7 + $0x260] sm:$0xff]  ;;  %v154_v12 = vld [vmem:[#allocation7 + $0xf8] sm:$0xff] }
  0x36   :  { %244 = vmatpush.msra.mxu0 %v147_v38  ;;  %285 = vmatpush.msra.mxu2 %v143_v40  ;;  %v386_v6 = vld [vmem:[#allocation10 + $0x210] sm:$0xff]  ;;  %v384_v10 = vld [vmem:[#allocation10 + $0x1e8] sm:$0xff]  ;;  %v381_v14 = vld [vmem:[#allocation10 + $0x1b8] sm:$0xff] }
  0x37   :  { %305 = vmatpush.msra.mxu3 %v144_v41  ;;  %260 = vmatpush.msra.mxu1 %v172_v57  ;;  %v193_v11 = vld [vmem:[#allocation7 + $0x230] sm:$0xff]  ;;  %v187_v15 = vld [vmem:[#allocation7 + $0x200] sm:$0xff]  ;;  %v148_v16 = vld [vmem:[#allocation7 + $0xc8] sm:$0xff] }
  0x38   :  { %245 = vmatpush.msra.mxu0 %v141_v42  ;;  %286 = vmatpush.msra.mxu2 %v137_v44  ;;  %v380_v13 = vld [vmem:[#allocation10 + $0x1b0] sm:$0xff]  ;;  %v377_v17 = vld [vmem:[#allocation10 + $0x180] sm:$0xff]  ;;  %v378_v18 = vld [vmem:[#allocation10 + $0x188] sm:$0xff] }
  0x39   :  { %306 = vmatpush.msra.mxu3 %v138_v45  ;;  %261 = vmatpush.msra.mxu1 %v166_v61  ;;  %v181_v19 = vld [vmem:[#allocation7 + $0x1d0] sm:$0xff]  ;;  %v142_v20 = vld [vmem:[#allocation7 + $0x98] sm:$0xff]  ;;  %v175_v23 = vld [vmem:[#allocation7 + $0x1a0] sm:$0xff] }
  0x3a   :  { %246 = vmatpush.msra.mxu0 %v135_v46  ;;  %287 = vmatpush.msra.mxu2 %v131_v48  ;;  %v374_v21 = vld [vmem:[#allocation10 + $0x150] sm:$0xff]  ;;  %v375_v22 = vld [vmem:[#allocation10 + $0x158] sm:$0xff]  ;;  %v136_v24 = vld [vmem:[#allocation7 + $0x68] sm:$0xff] }
  0x3b   :  { %307 = vmatpush.msra.mxu3 %v132_v49  ;;  %262 = vmatpush.msra.mxu1 %v160_v1  ;;  %v371_v25 = vld [vmem:[#allocation10 + $0x120] sm:$0xff]  ;;  %v372_v26 = vld [vmem:[#allocation10 + $0x128] sm:$0xff]  ;;  %v130_v28 = vld [vmem:[#allocation7 + $0x38] sm:$0xff] }
  0x3c   :  { %247 = vmatpush.msra.mxu0 %v129_v50  ;;  %288 = vmatpush.msra.mxu2 %v125_v52  ;;  %v169_v27 = vld [vmem:[#allocation7 + $0x170] sm:$0xff]  ;;  %v369_v30 = vld [vmem:[#allocation10 + $0xf8] sm:$0xff]  ;;  %v124_v32 = vld [vmem:[#allocation7 + $0x8] sm:$0xff] }
  0x3d   :  { %308 = vmatpush.msra.mxu3 %v126_v53  ;;  %289 = vmatmul.f32.vlgmr.msra.gmra.mxu2 %v1074_v5  ;;  %v368_v29 = vld [vmem:[#allocation10 + $0xf0] sm:$0xff]  ;;  %v163_v31 = vld [vmem:[#allocation7 + $0x140] sm:$0xff]  ;;  %v366_v34 = vld [vmem:[#allocation10 + $0xc8] sm:$0xff] }
  0x3e   :  { %401 = vmatpush.msrb.mxu2 %v398_v54  ;;  %248 = vmatpush.msra.mxu0 %v123_v56  ;;  %v365_v33 = vld [vmem:[#allocation10 + $0xc0] sm:$0xff]  ;;  %v157_v35 = vld [vmem:[#allocation7 + $0x110] sm:$0xff]  ;;  %v363_v37 = vld [vmem:[#allocation10 + $0x98] sm:$0xff] }
  0x3f   :  { %421 = vmatpush.msrb.mxu3 %v399_v55  ;;  %263 = vmatpush.msra.mxu1 %v154_v12  ;;  %v362_v36 = vld [vmem:[#allocation10 + $0x90] sm:$0xff]  ;;  %v151_v38 = vld [vmem:[#allocation7 + $0xe0] sm:$0xff]  ;;  %v360_v40 = vld [vmem:[#allocation10 + $0x68] sm:$0xff] }
  0x40   :  { %402 = vmatpush.msrb.mxu2 %v395_v58  ;;  %313 = vmatpush.msrb.mxu0 %v217_v60  ;;  %v359_v39 = vld [vmem:[#allocation10 + $0x60] sm:$0xff]  ;;  %v145_v41 = vld [vmem:[#allocation7 + $0xb0] sm:$0xff]  ;;  %v357_v43 = vld [vmem:[#allocation10 + $0x38] sm:$0xff] }
  0x41   :  { %422 = vmatpush.msrb.mxu3 %v396_v59  ;;  %264 = vmatpush.msra.mxu1 %v148_v16  ;;  %v356_v42 = vld [vmem:[#allocation10 + $0x30] sm:$0xff]  ;;  %v139_v44 = vld [vmem:[#allocation7 + $0x80] sm:$0xff]  ;;  %v354_v46 = vld [vmem:[#allocation10 + $0x8] sm:$0xff] }
  0x42   :  { %403 = vmatpush.msrb.mxu2 %v392_v62  ;;  %314 = vmatpush.msrb.mxu0 %v211_v0  ;;  %v353_v45 = vld [vmem:[#allocation10] sm:$0xff]  ;;  %v133_v47 = vld [vmem:[#allocation7 + $0x50] sm:$0xff]  ;;  %v1079_v48 = vld [vmem:[#allocation5] sm:$0xff] }
  0x43   :  { %423 = vmatpush.msrb.mxu3 %v393_v63  ;;  %265 = vmatpush.msra.mxu1 %v142_v20  ;;  %v127_v49 = vld [vmem:[#allocation7 + $0x20] sm:$0xff]  ;;  %v397_v51 = vld [vmem:[#allocation10 + $0x2b0] sm:$0xff]  ;;  %v212_v53 = vld [vmem:[#allocation7 + $0x2c8] sm:$0xff] }
  0x44   :  { %404 = vmatpush.msrb.mxu2 %v389_v2  ;;  %315 = vmatpush.msrb.mxu0 %v205_v4  ;;  %v400_v50 = vld [vmem:[#allocation10 + $0x2e0] sm:$0xff]  ;;  %v218_v52 = vld [vmem:[#allocation7 + $0x2f8] sm:$0xff] }
  0x45   :  { %424 = vmatpush.msrb.mxu3 %v390_v3  ;;  %266 = vmatpush.msra.mxu1 %v136_v24  ;;  %v394_v54 = vld [vmem:[#allocation10 + $0x280] sm:$0xff]  ;;  %v206_v55 = vld [vmem:[#allocation7 + $0x298] sm:$0xff]  ;;  %v556_v24 = vld [vmem:[#allocation10 + $0x2c8] sm:$0xff] }
  0x46   :  { %405 = vmatpush.msrb.mxu2 %v386_v6  ;;  %316 = vmatpush.msrb.mxu0 %v199_v8  ;;  %v391_v56 = vld [vmem:[#allocation10 + $0x250] sm:$0xff]  ;;  %v388_v57 = vld [vmem:[#allocation10 + $0x220] sm:$0xff] }
  0x47   :  { %425 = vmatpush.msrb.mxu3 %v387_v7  ;;  %267 = vmatpush.msra.mxu1 %v130_v28  ;;  %v385_v58 = vld [vmem:[#allocation10 + $0x1f0] sm:$0xff]  ;;  %v382_v59 = vld [vmem:[#allocation10 + $0x1c0] sm:$0xff] }
  0x48   :  { %309 = vmatmul.f32.vlgmr.msra.gmra.mxu3 %v1074_v5  ;;  %406 = vmatpush.msrb.mxu2 %v383_v9  ;;  %v379_v60 = vld [vmem:[#allocation10 + $0x190] sm:$0xff]  ;;  %v376_v61 = vld [vmem:[#allocation10 + $0x160] sm:$0xff] }
  0x49   :  { %426 = vmatpush.msrb.mxu3 %v384_v10  ;;  %317 = vmatpush.msrb.mxu0 %v193_v11  ;;  %v373_v62 = vld [vmem:[#allocation10 + $0x130] sm:$0xff]  ;;  %v370_v63 = vld [vmem:[#allocation10 + $0x100] sm:$0xff] }
  0x4a   :  { %407 = vmatpush.msrb.mxu2 %v380_v13  ;;  %268 = vmatpush.msra.mxu1 %v124_v32  ;;  %v367_v0 = vld [vmem:[#allocation10 + $0xd0] sm:$0xff]  ;;  %v364_v1 = vld [vmem:[#allocation10 + $0xa0] sm:$0xff]  ;;  %v550_v32 = vld [vmem:[#allocation10 + $0x268] sm:$0xff] }
  0x4b   :  { %427 = vmatpush.msrb.mxu3 %v381_v14  ;;  %318 = vmatpush.msrb.mxu0 %v187_v15  ;;  %v361_v2 = vld [vmem:[#allocation10 + $0x70] sm:$0xff]  ;;  %v358_v3 = vld [vmem:[#allocation10 + $0x40] sm:$0xff] }
  0x4c   :  { %408 = vmatpush.msrb.mxu2 %v377_v17  ;;  %269 = vmatmul.f32.vlgmr.msra.gmra.mxu1 %v1074_v5  ;;  %v355_v4 = vld [vmem:[#allocation10 + $0x10] sm:$0xff]  ;;  %v200_v6 = vld [vmem:[#allocation7 + $0x268] sm:$0xff] }
  0x4d   :  { %428 = vmatpush.msrb.mxu3 %v378_v18  ;;  %319 = vmatpush.msrb.mxu0 %v181_v19  ;;  %v194_v7 = vld [vmem:[#allocation7 + $0x238] sm:$0xff]  ;;  %v188_v8 = vld [vmem:[#allocation7 + $0x208] sm:$0xff] }
  0x4e   :  { %409 = vmatpush.msrb.mxu2 %v374_v21  ;;  %249 = vmatmul.f32.vlgmr.msra.gmra.mxu0 %v1074_v5  ;;  %v182_v9 = vld [vmem:[#allocation7 + $0x1d8] sm:$0xff]  ;;  %v176_v10 = vld [vmem:[#allocation7 + $0x1a8] sm:$0xff] }
  0x4f   :  { %429 = vmatpush.msrb.mxu3 %v375_v22  ;;  %320 = vmatpush.msrb.mxu0 %v175_v23  ;;  %v170_v11 = vld [vmem:[#allocation7 + $0x178] sm:$0xff]  ;;  %v164_v12 = vld [vmem:[#allocation7 + $0x148] sm:$0xff] }
  0x50   :  { %410 = vmatpush.msrb.mxu2 %v371_v25  ;;  %333 = vmatpush.msrb.mxu1 %v218_v52  ;;  %v158_v13 = vld [vmem:[#allocation7 + $0x118] sm:$0xff]  ;;  %v152_v14 = vld [vmem:[#allocation7 + $0xe8] sm:$0xff] }
  0x51   :  { %430 = vmatpush.msrb.mxu3 %v372_v26  ;;  %321 = vmatpush.msrb.mxu0 %v169_v27  ;;  %v146_v15 = vld [vmem:[#allocation7 + $0xb8] sm:$0xff]  ;;  %v140_v16 = vld [vmem:[#allocation7 + $0x88] sm:$0xff] }
  0x52   :  { %411 = vmatpush.msrb.mxu2 %v368_v29  ;;  %334 = vmatpush.msrb.mxu1 %v212_v53  ;;  %v134_v17 = vld [vmem:[#allocation7 + $0x58] sm:$0xff]  ;;  %v128_v18 = vld [vmem:[#allocation7 + $0x28] sm:$0xff] }
  0x53   :  { %431 = vmatpush.msrb.mxu3 %v369_v30  ;;  %322 = vmatpush.msrb.mxu0 %v163_v31  ;;  %v557_v19 = vld [vmem:[#allocation10 + $0x2e8] sm:$0xff]  ;;  %v558_v20 = vld [vmem:[#allocation10 + $0x2f0] sm:$0xff]  ;;  %v559_v21 = vld [vmem:[#allocation10 + $0x2f8] sm:$0xff] }
  0x54   :  { %412 = vmatpush.msrb.mxu2 %v365_v33  ;;  %335 = vmatpush.msrb.mxu1 %v206_v55  ;;  %v554_v22 = vld [vmem:[#allocation10 + $0x2b8] sm:$0xff]  ;;  %v555_v23 = vld [vmem:[#allocation10 + $0x2c0] sm:$0xff]  ;;  %v551_v25 = vld [vmem:[#allocation10 + $0x288] sm:$0xff] }
  0x55   :  { %432 = vmatpush.msrb.mxu3 %v366_v34  ;;  %323 = vmatpush.msrb.mxu0 %v157_v35  ;;  %v552_v26 = vld [vmem:[#allocation10 + $0x290] sm:$0xff]  ;;  %v553_v27 = vld [vmem:[#allocation10 + $0x298] sm:$0xff]  ;;  %v549_v31 = vld [vmem:[#allocation10 + $0x260] sm:$0xff] }
  0x56   :  { %413 = vmatpush.msrb.mxu2 %v362_v36  ;;  %336 = vmatpush.msrb.mxu1 %v200_v6  ;;  %v548_v30 = vld [vmem:[#allocation10 + $0x258] sm:$0xff]  ;;  %v545_v34 = vld [vmem:[#allocation10 + $0x228] sm:$0xff]  ;;  %v546_v35 = vld [vmem:[#allocation10 + $0x230] sm:$0xff] }
  0x57   :  { %433 = vmatpush.msrb.mxu3 %v363_v37  ;;  %324 = vmatpush.msrb.mxu0 %v151_v38  ;;  %v1091_v33 = vld [vmem:[#allocation8] sm:$0x3f]  ;;  %v533_v55 = vld [vmem:[#allocation10 + $0x168] sm:$0xff] }
  0x58   :  { %414 = vmatpush.msrb.mxu2 %v359_v39  ;;  %337 = vmatpush.msrb.mxu1 %v194_v7  ;;  %v547_v36 = vld [vmem:[#allocation10 + $0x238] sm:$0xff]  ;;  %v222_v37 = vperm.slane %v1091_v33, 1  ;;  %v543_v39 = vld [vmem:[#allocation10 + $0x200] sm:$0xff]  ;;  %v526_v6 = vld [vmem:[#allocation10 + $0xe8] sm:$0xff] }
  0x59   :  { %434 = vmatpush.msrb.mxu3 %v360_v40  ;;  %325 = vmatpush.msrb.mxu0 %v145_v41  ;;  %v542_v38 = vld [vmem:[#allocation10 + $0x1f8] sm:$0xff]  ;;  %v544_v40 = vld [vmem:[#allocation10 + $0x208] sm:$0xff] }
  0x5a   :  { %415 = vmatpush.msrb.mxu2 %v356_v42  ;;  %338 = vmatpush.msrb.mxu1 %v188_v8  ;;  %v521_v7 = vld [vmem:[#allocation10 + $0xa8] sm:$0xff]  ;;  %v522_v8 = vld [vmem:[#allocation10 + $0xb0] sm:$0xff] }
  0x5b   :  { %435 = vmatpush.msrb.mxu3 %v357_v43  ;;  %326 = vmatpush.msrb.mxu0 %v139_v44  ;;  %v539_v44 = vld [vmem:[#allocation10 + $0x1c8] sm:$0xff] }
  0x5c   :  { %416 = vmatpush.msrb.mxu2 %v353_v45  ;;  %339 = vmatpush.msrb.mxu1 %v182_v9  ;;  %v540_v45 = vld [vmem:[#allocation10 + $0x1d0] sm:$0xff]  ;;  %v523_v9 = vld [vmem:[#allocation10 + $0xb8] sm:$0xff] }
  0x5d   :  { %436 = vmatpush.msrb.mxu3 %v354_v46  ;;  %327 = vmatpush.msrb.mxu0 %v133_v47  ;;  %v541_v46 = vld [vmem:[#allocation10 + $0x1d8] sm:$0xff] }
  0x5e   :  { %417 = vmatmul.f32.vlgmr.msrb.gmra.mxu2 %v1079_v48  ;;  %437 = vmatmul.f32.vlgmr.msrb.gmra.mxu3 %v1079_v48 }
  0x5f   :  { %328 = vmatpush.msrb.mxu0 %v127_v49  ;;  %340 = vmatpush.msrb.mxu1 %v176_v10  ;;  %v536_v49 = vld [vmem:[#allocation10 + $0x198] sm:$0xff] }
  0x60   :  { %329 = vmatmul.f32.vlgmr.msrb.gmra.mxu0 %v1074_v5  ;;  %580 = vmatpush.msra.mxu2 %v558_v20  ;;  %v518_v10 = vld [vmem:[#allocation10 + $0x78] sm:$0xff] }
  0x61   :  { %441 = vmatpush.msra.mxu0 %v400_v50  ;;  %341 = vmatpush.msrb.mxu1 %v170_v11  ;;  %v537_v50 = vld [vmem:[#allocation10 + $0x1a0] sm:$0xff]  ;;  %v512_v20 = vld [vmem:[#allocation10 + $0x18] sm:$0xff] }
  0x62   :  { %600 = vmatpush.msra.mxu3 %v559_v21  ;;  %581 = vmatpush.msra.mxu2 %v555_v23  ;;  %v519_v11 = vld [vmem:[#allocation10 + $0x80] sm:$0xff] }
  0x63   :  { %442 = vmatpush.msra.mxu0 %v397_v51  ;;  %342 = vmatpush.msrb.mxu1 %v164_v12  ;;  %v538_v51 = vld [vmem:[#allocation10 + $0x1a8] sm:$0xff]  ;;  %v513_v21 = vld [vmem:[#allocation10 + $0x20] sm:$0xff] }
  0x64   :  { %601 = vmatpush.msra.mxu3 %v556_v24  ;;  %582 = vmatpush.msra.mxu2 %v552_v26  ;;  %v520_v12 = vld [vmem:[#allocation10 + $0x88] sm:$0xff] }
  0x65   :  { %443 = vmatpush.msra.mxu0 %v394_v54  ;;  %343 = vmatpush.msrb.mxu1 %v158_v13 }
  0x66   :  { %602 = vmatpush.msra.mxu3 %v553_v27  ;;  %583 = vmatpush.msra.mxu2 %v549_v31 }
  0x67   :  { %444 = vmatpush.msra.mxu0 %v391_v56  ;;  %344 = vmatpush.msrb.mxu1 %v152_v14  ;;  %v534_v56 = vld [vmem:[#allocation10 + $0x170] sm:$0xff]  ;;  %v515_v14 = vld [vmem:[#allocation10 + $0x48] sm:$0xff] }
  0x68   :  { %603 = vmatpush.msra.mxu3 %v550_v32  ;;  %584 = vmatpush.msra.mxu2 %v546_v35  ;;  %v223_v35 = vperm.slane %v1091_v33, 2 }
  0x69   :  { %445 = vmatpush.msra.mxu0 %v388_v57  ;;  %345 = vmatpush.msrb.mxu1 %v146_v15  ;;  %v535_v57 = vld [vmem:[#allocation10 + $0x178] sm:$0xff]  ;;  %v516_v15 = vld [vmem:[#allocation10 + $0x50] sm:$0xff] }
  0x6a   :  { %604 = vmatpush.msra.mxu3 %v547_v36  ;;  %585 = vmatpush.msra.mxu2 %v543_v39 }
  0x6b   :  { %446 = vmatpush.msra.mxu0 %v385_v58  ;;  %346 = vmatpush.msrb.mxu1 %v140_v16 }
  0x6c   :  { %605 = vmatpush.msra.mxu3 %v544_v40  ;;  %586 = vmatpush.msra.mxu2 %v540_v45 }
  0x6d   :  { %447 = vmatpush.msra.mxu0 %v382_v59  ;;  %347 = vmatpush.msrb.mxu1 %v134_v17 }
  0x6e   :  { %606 = vmatpush.msra.mxu3 %v541_v46  ;;  %587 = vmatpush.msra.mxu2 %v537_v50 }
  0x6f   :  { %448 = vmatpush.msra.mxu0 %v379_v60  ;;  %348 = vmatpush.msrb.mxu1 %v128_v18  ;;  %v530_v60 = vld [vmem:[#allocation10 + $0x138] sm:$0xff] }
  0x70   :  { %349 = vmatmul.f32.vlgmr.msrb.gmra.mxu1 %v1074_v5  ;;  %v221_v5 = vperm.slane %v1091_v33, 0  ;;  %607 = vmatpush.msra.mxu3 %v538_v51  ;;  %v517_v18 = vld [vmem:[#allocation10 + $0x58] sm:$0xff] }
  0x71   :  { %449 = vmatpush.msra.mxu0 %v376_v61  ;;  %560 = vmatpush.msra.mxu1 %v557_v19  ;;  %v531_v61 = vld [vmem:[#allocation10 + $0x140] sm:$0xff] }
  0x72   :  { %588 = vmatpush.msra.mxu2 %v534_v56  ;;  %608 = vmatpush.msra.mxu3 %v535_v57 }
  0x73   :  { %450 = vmatpush.msra.mxu0 %v373_v62  ;;  %561 = vmatpush.msra.mxu1 %v554_v22  ;;  %v532_v62 = vld [vmem:[#allocation10 + $0x148] sm:$0xff] }
  0x74   :  { %589 = vmatpush.msra.mxu2 %v531_v61  ;;  %609 = vmatpush.msra.mxu3 %v532_v62  ;;  %v514_v22 = vld [vmem:[#allocation10 + $0x28] sm:$0xff]  ;;  %v685_v61 = vld [vmem:[#allocation11 + $0x60] sm:$0xff]  ;;  %v224_v62 = vperm.slane %v1091_v33, 3 }
  0x75   :  { %451 = vmatpush.msra.mxu0 %v370_v63  ;;  %562 = vmatpush.msra.mxu1 %v551_v25 }
  0x77   :  { %452 = vmatpush.msra.mxu0 %v367_v0  ;;  %563 = vmatpush.msra.mxu1 %v548_v30  ;;  %v527_v0 = vld [vmem:[#allocation10 + $0x108] sm:$0xff] }
  0x79   :  { %453 = vmatpush.msra.mxu0 %v364_v1  ;;  %564 = vmatpush.msra.mxu1 %v545_v34  ;;  %v528_v1 = vld [vmem:[#allocation10 + $0x110] sm:$0xff]  ;;  %v767_v34 = vld [vmem:[%s1134_s5] ss:$0 sm:$0xff] }
  0x7a   :  { %590 = vmatpush.msra.mxu2 %v528_v1 }
  0x7b   :  { %454 = vmatpush.msra.mxu0 %v361_v2  ;;  %565 = vmatpush.msra.mxu1 %v542_v38  ;;  %v529_v2 = vld [vmem:[#allocation10 + $0x118] sm:$0xff] }
  0x7c   :  { %610 = vmatpush.msra.mxu3 %v529_v2  ;;  %v681_v2 = vld [vmem:[#allocation11 + $0x40] sm:$0xff] }
  0x7d   :  { %455 = vmatpush.msra.mxu0 %v358_v3  ;;  %566 = vmatpush.msra.mxu1 %v539_v44  ;;  %v524_v3 = vld [vmem:[#allocation10 + $0xd8] sm:$0xff] }
  0x7e   :  { %611 = vmatpush.msra.mxu3 %v526_v6 }
  0x7f   :  { %456 = vmatpush.msra.mxu0 %v355_v4  ;;  %567 = vmatpush.msra.mxu1 %v536_v49  ;;  %v525_v4 = vld [vmem:[#allocation10 + $0xe0] sm:$0xff] }
  0x80   :  { %457 = vmatmul.f32.vlgmr.msra.gmra.mxu0 %v1079_v48  ;;  %591 = vmatpush.msra.mxu2 %v525_v4  ;;  %v225_v4 = vperm.slane %v1091_v33, 4 }
  0x81   :  { %568 = vmatpush.msra.mxu1 %v533_v55  ;;  %612 = vmatpush.msra.mxu3 %v523_v9  ;;  %v679_v9 = vld [vmem:[#allocation11 + $0x30] sm:$0xff] }
  0x82   :  { %592 = vmatpush.msra.mxu2 %v522_v8 }
  0x83   :  { %569 = vmatpush.msra.mxu1 %v530_v60  ;;  %613 = vmatpush.msra.mxu3 %v520_v12  ;;  %v677_v12 = vld [vmem:[#allocation11 + $0x20] sm:$0xff] }
  0x84   :  { %593 = vmatpush.msra.mxu2 %v519_v11 }
  0x85   :  { %570 = vmatpush.msra.mxu1 %v527_v0  ;;  %614 = vmatpush.msra.mxu3 %v517_v18  ;;  %v682_v0 = vld [vmem:[#allocation11 + $0x48] sm:$0xff] }
  0x86   :  { %594 = vmatpush.msra.mxu2 %v516_v15  ;;  %v674_v18 = vld [vmem:[#allocation11 + $0x8] sm:$0xff] }
  0x87   :  { %571 = vmatpush.msra.mxu1 %v524_v3  ;;  %615 = vmatpush.msra.mxu3 %v514_v22 }
  0x88   :  { %595 = vmatpush.msra.mxu2 %v513_v21 }
  0x89   :  { %572 = vmatpush.msra.mxu1 %v521_v7  ;;  %v680_v7 = vld [vmem:[#allocation11 + $0x38] sm:$0xff] }
  0x8b   :  { %573 = vmatpush.msra.mxu1 %v518_v10  ;;  %v678_v10 = vld [vmem:[#allocation11 + $0x28] sm:$0xff] }
  0x8d   :  { %574 = vmatpush.msra.mxu1 %v515_v14 }
  0x8f   :  { %575 = vmatpush.msra.mxu1 %v512_v20  ;;  %v673_v20 = vld [vmem:[#allocation11] sm:$0xff] }
  0xc0   :  { %v1087_v28 = vpop.f32.mrf.mxu2 }
  0xc9   :  { %v270_v42 = vpop.f32.mrf.mxu1 }
  0xca   :  { %v271_v47 = vadd.f32 %v270_v42, %v222_v37 }
  0xcb   :  { %v1089_v29 = vpop.f32.mrf.mxu3  ;;  %v250_v41 = vpop.f32.mrf.mxu0 }
  0xcc   :  { %v251_v43 = vadd.f32 %v250_v41, %v221_v5  ;;  %v311_v1 = vadd.f32 %v1089_v29, %v224_v62  ;;  %v676_v29 = vld [vmem:[#allocation11 + $0x18] sm:$0xff] }
  0xdd   :  { %v1095_v23 = vpop.f32.mrf.mxu0 }
  0xde   :  { %v331_v11 = vadd.f32 %v1095_v23, %v225_v4 }
  0xe1   :  { %v418_v52 = vpop.f32.mrf.mxu2  ;;  %v438_v54 = vpop.f32.mrf.mxu3 }
  0xe2   :  { %v461_v53 = vadd.f32 %v418_v52, %v251_v43  ;;  %v481_v58 = vadd.f32 %v438_v54, %v271_v47  ;;  %v291_v43 = vadd.f32 %v1087_v28, %v223_v35  ;;  %v688_v28 = vld [vmem:[#allocation11 + $0x78] sm:$0xff] }
  0xe3   :  { %693 = vmatpush.msrb.mxu0 %v688_v28 }
  0xe4   :  { %v750_v59 = vmul.f32 -1.442695, %v461_v53  ;;  %v751_v63 = vmul.f32 -1.442695, %v481_v58  ;;  %v687_v58 = vld [vmem:[#allocation11 + $0x70] sm:$0xff] }
  0xe5   :  { %694 = vmatpush.msrb.mxu0 %v687_v58 }
  0xe6   :  { %770 = vpow2.f32 %v750_v59  ;;  %v686_v59 = vld [vmem:[#allocation11 + $0x68] sm:$0xff] }
  0xe7   :  { %772 = vpow2.f32 %v751_v63  ;;  %695 = vmatpush.msrb.mxu0 %v686_v59  ;;  %v683_v63 = vld [vmem:[#allocation11 + $0x50] sm:$0xff] }
  0xe9   :  { %696 = vmatpush.msrb.mxu0 %v685_v61 }
  0xec   :  { %v771_v13 = vpop.eup %770 }
  0xed   :  { %v773_v16 = vpop.eup %772  ;;  %v465_v17 = vadd.f32 1.0, %v771_v13  ;;  %v1108_v60 = vpop.f32.mrf.mxu1 }
  0xee   :  { %v485_v19 = vadd.f32 1.0, %v773_v16  ;;  %v675_v16 = vld [vmem:[#allocation11 + $0x10] sm:$0xff] }
  0xef   :  { %774 = vrcp.f32 %v465_v17  ;;  %v477_v31 = vand.u32 2147483648, %v465_v17  ;;  %v475_v5 = vand.u32 2147483647, %v465_v17  ;;  %vm471_vm1 = vweird.f32 %v465_v17 }
  0xf0   :  { %776 = vrcp.f32 %v485_v19  ;;  %vm491_vm4 = vweird.f32 %v485_v19  ;;  %v497_v47 = vand.u32 2147483648, %v485_v19  ;;  %v495_v50 = vand.u32 2147483647, %v485_v19 }
  0xf1   :  { %v478_v39 = vor.u32 1.1754944e-38, %v477_v31  ;;  %vm476_vm3 = vcmp.eq.f32.partialorder %v475_v5, 8.507059e+37  ;;  %v768_v31 = vld [vmem:[%s1134_s5 + $0x1] ss:$0 sm:$0xff]  ;;  %s1004_s5 = smov [#allocation13]  }
  0xf2   :  { %v498_v51 = vor.u32 1.1754944e-38, %v497_v47  ;;  %vm496_vm7 = vcmp.eq.f32.partialorder %v495_v50, 8.507059e+37  ;;  %s719_s20 = sshll.u32 %s1004_s5, 4  ;;  %s720_s20 = int_to_ptr.vmem [resolvable:$true] %s719_s20 }
  0xf5   :  { %v775_v24 = vpop.eup %774 }
  0xf6   :  { %v777_v25 = vpop.eup %776  ;;  %v467_v26 = vmul.f32 %v775_v24, %v465_v17  ;;  %vm472_vm0 = vweird.f32 %v775_v24 }
  0xf7   :  { %v487_v30 = vmul.f32 %v777_v25, %v485_v19  ;;  %vm473_vm2 = vmor %vm471_vm1, %vm472_vm0  ;;  %vm492_vm5 = vweird.f32 %v777_v25 }
  0xf8   :  { %v468_v27 = vsub.f32 1.0, %v467_v26  ;;  %vm493_vm6 = vmor %vm491_vm4, %vm492_vm5 }
  0xf9   :  { %v488_v37 = vsub.f32 1.0, %v487_v30 }
  0xfa   :  { %v469_v32 = vmul.f32 %v775_v24, %v468_v27 }
  0xfb   :  { %v489_v45 = vmul.f32 %v777_v25, %v488_v37 }
  0xfc   :  { %v470_v36 = vadd.f32 %v775_v24, %v469_v32 }
  0xfd   :  { %v458_v38 = vpop.f32.mrf.mxu0  ;;  %v490_v49 = vadd.f32 %v777_v25, %v489_v45 }
  0xfe   :  { %v474_v40 = vsel %vm473_vm2, %v775_v24, %v470_v36  ;;  %v505_v41 = vadd.f32 %v767_v34, %v458_v38  ;;  %v226_v34 = vperm.slane %v1091_v33, 5 }
  0xff   :  { %v479_v42 = vsel %vm476_vm3, %v478_v39, %v474_v40  ;;  %v494_v52 = vsel %vm493_vm6, %v777_v25, %v490_v49 }
 0x100   :  { %v506_v44 = vmul.f32 %v505_v41, %v479_v42  ;;  %v499_v55 = vsel %vm496_vm7, %v498_v51, %v494_v52  ;;  %v351_v42 = vadd.f32 %v1108_v60, %v226_v34 }
 0x102   :  { %v507_v46 = vadd.f32 %v506_v44, %v291_v43 }
 0x104   :  { %778 = vtanh.f32 %v507_v46 }
 0x10a   :  { %v779_v53 = vpop.eup %778 }
 0x10b   :  { %v509_v54 = vsub.f32 %v1079_v48, %v779_v53  ;;  %v684_v48 = vld [vmem:[#allocation11 + $0x58] sm:$0xff] }
 0x10c   :  { %697 = vmatpush.msrb.mxu0 %v684_v48 }
 0x10d   :  { %v510_v56 = vmul.f32 %v509_v54, %v499_v55 }
 0x10e   :  { %698 = vmatpush.msrb.mxu0 %v683_v63 }
 0x10f   :  { %v1103_v57 = vadd.f32 %v779_v53, %v510_v56  ;;  %v769_v56 = vld [vmem:[%s1136_s7] ss:$0 sm:$0xff] }
 0x110   :  { %699 = vmatpush.msrb.mxu0 %v682_v0 }
 0x111   :  { %576 = vmatmul.f32.vlgmr.msra.gmra.mxu1 %v1103_v57  ;;  %596 = vmatmul.f32.vlgmr.msra.gmra.mxu2 %v1103_v57 }
 0x112   :  { %616 = vmatmul.f32.vlgmr.msra.gmra.mxu3 %v1103_v57  ;;  %700 = vmatpush.msrb.mxu0 %v681_v2 }
 0x114   :  { %701 = vmatpush.msrb.mxu0 %v680_v7 }
 0x116   :  { %702 = vmatpush.msrb.mxu0 %v679_v9 }
 0x118   :  { %703 = vmatpush.msrb.mxu0 %v678_v10 }
 0x11a   :  { %704 = vmatpush.msrb.mxu0 %v677_v12 }
 0x11c   :  { %705 = vmatpush.msrb.mxu0 %v676_v29 }
 0x11e   :  { %706 = vmatpush.msrb.mxu0 %v675_v16 }
 0x120   :  { %707 = vmatpush.msrb.mxu0 %v674_v18 }
 0x122   :  { %708 = vmatpush.msrb.mxu0 %v673_v20 }
 0x18e   :  { %v577_v3 = vpop.f32.mrf.mxu1 }
 0x18f   :  { %v620_v6 = vadd.f32 %v577_v3, %v311_v1 }
 0x191   :  { %v752_v8 = vmul.f32 -1.442695, %v620_v6 }
 0x193   :  { %780 = vpow2.f32 %v752_v8 }
 0x194   :  { %v597_v13 = vpop.f32.mrf.mxu2 }
 0x195   :  { %v640_v14 = vadd.f32 %v597_v13, %v331_v11  ;;  %v617_v5 = vpop.f32.mrf.mxu3 }
 0x196   :  { %v665_v40 = vadd.f32 %v768_v31, %v617_v5 }
 0x197   :  { %v753_v15 = vmul.f32 -1.442695, %v640_v14 }
 0x199   :  { %v781_v17 = vpop.eup %780  ;;  %782 = vpow2.f32 %v753_v15 }
 0x19a   :  { %v624_v19 = vadd.f32 1.0, %v781_v17 }
 0x19c   :  { %784 = vrcp.f32 %v624_v19  ;;  %v636_v26 = vand.u32 2147483648, %v624_v19  ;;  %v634_v30 = vand.u32 2147483647, %v624_v19  ;;  %vm630_vm9 = vweird.f32 %v624_v19 }
 0x19e   :  { %v637_v37 = vor.u32 1.1754944e-38, %v636_v26  ;;  %vm635_vm11 = vcmp.eq.f32.partialorder %v634_v30, 8.507059e+37 }
 0x19f   :  { %v783_v21 = vpop.eup %782 }
 0x1a0   :  { %v644_v22 = vadd.f32 1.0, %v783_v21 }
 0x1a2   :  { %v785_v23 = vpop.eup %784  ;;  %786 = vrcp.f32 %v644_v22  ;;  %v656_v47 = vand.u32 2147483648, %v644_v22  ;;  %vm650_vm13 = vweird.f32 %v644_v22  ;;  %v654_v33 = vand.u32 2147483647, %v644_v22 }
 0x1a3   :  { %v626_v24 = vmul.f32 %v785_v23, %v624_v19  ;;  %vm631_vm8 = vweird.f32 %v785_v23 }
 0x1a4   :  { %vm632_vm10 = vmor %vm630_vm9, %vm631_vm8  ;;  %v657_v51 = vor.u32 1.1754944e-38, %v656_v47  ;;  %vm655_vm15 = vcmp.eq.f32.partialorder %v654_v33, 8.507059e+37 }
 0x1a5   :  { %v627_v25 = vsub.f32 1.0, %v626_v24 }
 0x1a7   :  { %v628_v27 = vmul.f32 %v785_v23, %v627_v25 }
 0x1a8   :  { %v787_v32 = vpop.eup %786 }
 0x1a9   :  { %v646_v35 = vmul.f32 %v787_v32, %v644_v22  ;;  %v629_v36 = vadd.f32 %v785_v23, %v628_v27  ;;  %vm651_vm12 = vweird.f32 %v787_v32 }
 0x1aa   :  { %vm652_vm14 = vmor %vm650_vm13, %vm651_vm12 }
 0x1ab   :  { %v647_v38 = vsub.f32 1.0, %v646_v35  ;;  %v633_v39 = vsel %vm632_vm10, %v785_v23, %v629_v36 }
 0x1ac   :  { %v638_v41 = vsel %vm635_vm11, %v637_v37, %v633_v39 }
 0x1ad   :  { %v666_v43 = vmul.f32 %v665_v40, %v638_v41  ;;  %v648_v44 = vmul.f32 %v787_v32, %v647_v38 }
 0x1af   :  { %v667_v45 = vadd.f32 %v666_v43, %v351_v42  ;;  %v649_v46 = vadd.f32 %v787_v32, %v648_v44 }
 0x1b1   :  { %788 = vtanh.f32 %v667_v45  ;;  %v653_v49 = vsel %vm652_vm14, %v787_v32, %v649_v46 }
 0x1b2   :  { %v658_v53 = vsel %vm655_vm15, %v657_v51, %v653_v49 }
 0x1b7   :  { %v789_v50 = vpop.eup %788 }
 0x1b8   :  { %v669_v52 = vsub.f32 %v1103_v57, %v789_v50 }
 0x1ba   :  { %v670_v54 = vmul.f32 %v669_v52, %v658_v53 }
 0x1bc   :  { %v671_v55 = vadd.f32 %v789_v50, %v670_v54 }
 0x1be   :  { %709 = vmatmul.f32.vlgmr.msrb.gmra.mxu0 %v671_v55  ;;  %672 = vst [vmem:[#allocation13] sm:$0xff] %v671_v55 }
 0x1bf   :  { %724 = dma.vmem_to_hbm [thread:$0]  %s720_s20, 128, %s722_s22, [#allocation4]  }
 0x23b   :  { %v710_v57 = vpop.f32.mrf.mxu0 }
 0x23c   :  { %v711_v28 = vadd.f32 %v769_v56, %v710_v57 }
 0x23e   :  { %713 = vst [vmem:[#allocation14] sm:$0xff] %v711_v28 }
 0x23f   :  { %735 = dma.vmem_to_hbm [thread:$0]  %s731_s3, 128, %s733_s28, [#allocation15]  }
 0x240   :  { %990 = dma.done.wait [#allocation4], 128  }
 0x241   :  { %991 = vsyncadd [#allocation4], 4294967168 }
 0x242   :  { %992 = dma.done.wait [#allocation15], 128  }
 0x243   :  { %993 = vsyncadd [#allocation15], 4294967168 }
 0x244   :  { %744 = vsyncpa [#allocation3], 1 }
 0x245   :  { %745 = vsyncpa [#allocation6], 1 }
 0x246   :  { %746 = vsyncpa [#allocation9], 1 }
 0x247   :  { %747 = vsyncpa [#allocation12], 1 }
 0x248   :  { %748 = vsyncpa [#allocation4], 1 }
 0x249   :  { %749 = vsyncpa [#allocation15], 1 }

</bundles_post_ra>
